<compile_context>
chip_gen: v7x
topology: tpu7x:2x2x1
jax: 0.10.0
libtpu: 0.0.40
codegen_flags: <defaults>
</compile_context>

<pallas_src>
import functools

import jax
import jax.numpy as jnp
from jax.experimental import pallas as pl
from jax.experimental.pallas import tpu as pltpu

_LANE = 128


def _ce_sum(logits, tgt):
    """Sum over rows of -log_softmax(logits)[row, tgt[row]].  logits: (N, C), tgt: (N, 1) int32.
    Caller must guarantee 0 <= tgt < C (same contract as the torch / jnp references)."""
    x = logits.astype(jnp.float32)
    m = jnp.max(x, axis=-1, keepdims=True)                        # (N, 1)
    shifted = x - m
    lse = jnp.log(jnp.sum(jnp.exp(shifted), axis=-1, keepdims=True))      # logsumexp - m
    col = jax.lax.broadcasted_iota(jnp.int32, x.shape, 1)         # (N, C)
    picked = jnp.sum(jnp.where(col == tgt, shifted, 0.0),
                     axis=-1, keepdims=True)                      # logits[tgt] - m
    return jnp.sum(lse - picked)                                  # per-row nll; m cancels


def _critic_loss2_kernel(real_logits_ref, fake_logits_ref, target_ref,
                         real_attn_ref, fake_attn_ref,
                         out_ref, acc_ref,
                         *, n, rows, block_rows, tiles_per_split,
                         first_masked_tile, total_tiles, beta, sigma):
    split = pl.program_id(0)            # "parallel" axis -> a TensorCore on v7x
    i = pl.program_id(1)                # "arbitrary" streaming axis
    gt = split * tiles_per_split + i    # nominal global tile index (may overshoot the data)

    # Streamed attention tiles, cast to f32 in-kernel (free VPU work; keeps HBM traffic
    # at the native dtype width).
    tile = real_attn_ref[...].astype(jnp.float32) + fake_attn_ref[...].astype(jnp.float32)

    def _accum(t):
        # Fold accumulator init into the first tile of this split (no zeros store+reload).
        @pl.when(i == 0)
        def _():
            acc_ref[...] = t

        @pl.when(i > 0)
        def _():
            acc_ref[...] += t

    if first_masked_tile >= total_tiles:
        # Grid covers the data exactly and the last tile is full: no masking anywhere.
        _accum(tile)
    else:
        # Only the ragged last tile and any over-provisioned (clamped) tiles pay the
        # iota/compare/select; every other step is a bare VPU add.
        @pl.when(gt < first_masked_tile)
        def _():
            _accum(tile)

        @pl.when(gt >= first_masked_tile)
        def _():
            grow = gt * block_rows + jax.lax.broadcasted_iota(jnp.int32, tile.shape, 0)
            _accum(jnp.where(grow < rows, tile, 0.0))

    # Finalize once per split: single cross-lane reduce + scalar combine.
    @pl.when(i == pl.num_programs(1) - 1)
    def _():
        partial = -jnp.float32(beta) * jnp.sum(acc_ref[...])

        @pl.when(split == 0)
        def _():
            tgt = target_ref[...]                                 # (N, 1) int32
            ce = _ce_sum(real_logits_ref[...], tgt) + _ce_sum(fake_logits_ref[...], tgt)
            val = partial + jnp.float32(sigma) * ce / jnp.float32(n)
            out_ref[...] = jnp.full((8, _LANE), val, jnp.float32)

        @pl.when(split != 0)
        def _():
            out_ref[...] = jnp.full((8, _LANE), partial, jnp.float32)


def _to_lane_matrix(x):
    """View x as (rows, 128) in its native dtype (pure reshape in the common case)."""
    flat = x.reshape(-1)
    pad = (-flat.shape[0]) % _LANE
    if pad:
        # TODO(synk): rare path (numel not a multiple of 128) pays one XLA pad copy;
        # typical attention shapes (incl. the demo) never hit it.
        flat = jnp.pad(flat, (0, pad))
    return flat.reshape(-1, _LANE)


def critic_loss2(real_preds, fake_preds, target, beta=1e-07, sigma=1.0,
                 block_rows=1024, num_splits=2):
    real_logits, fake_logits = real_preds[0], fake_preds[0]
    real_attn, fake_attn = real_preds[2], fake_preds[2]

    n, num_classes = real_logits.shape
    t2 = target.astype(jnp.int32).reshape(n, 1)

    rmat = _to_lane_matrix(real_attn)          # streamed in native dtype (bf16 stays bf16)
    fmat = _to_lane_matrix(fake_attn)
    assert rmat.shape == fmat.shape, "real/fake attention shapes must match"
    rows = rmat.shape[0]

    # Largest sensible sublane-aligned tile (default 1024 rows amortizes per-step overhead).
    block_rows = max(8, min(block_rows, ((rows + 7) // 8) * 8))
    num_tiles = pl.cdiv(rows, block_rows)
    num_splits = max(1, min(num_splits, num_tiles))      # don't over-split tiny inputs
    tiles_per_split = pl.cdiv(num_tiles, num_splits)
    total_tiles = num_splits * tiles_per_split
    ragged = (rows % block_rows) != 0
    first_masked_tile = (num_tiles - 1) if ragged else num_tiles

    kernel = functools.partial(
        _critic_loss2_kernel,
        n=n, rows=rows, block_rows=block_rows, tiles_per_split=tiles_per_split,
        first_masked_tile=first_masked_tile, total_tiles=total_tiles,
        beta=float(beta), sigma=float(sigma))

    last_tile = num_tiles - 1

    def attn_map(s, i):
        # Clamp so an over-provisioned split never DMAs past the array; such tiles are
        # fully masked to zero in-kernel.
        return (jnp.minimum(s * tiles_per_split + i, last_tile), 0)

    const_map = lambda s, i: (0, 0)
    resident = pl.Buffered(buffer_count=1)     # DMA'd once, never changes: no 2nd buffer

    # VMEM audit (v7x has the smallest scoped default): only raise the limit when needed.
    vmem_est = (2 * n * num_classes * real_logits.dtype.itemsize   # resident logits (1-buf)
                + n * 4                                            # resident target
                + 2 * 2 * block_rows * _LANE * rmat.dtype.itemsize # 2 streams x 2 buffers
                + block_rows * _LANE * 4                           # f32 accumulator
                + num_splits * 8 * _LANE * 4)                      # output blocks
    vmem_limit = None
    if vmem_est > 16 * 1024 * 1024:
        vmem_limit = min(int(vmem_est * 3) // 2, 64 * 1024 * 1024)
    # TODO(synk): for classifier-sized C on v7x, tile the CE over C with an online
    # logsumexp instead of holding both full (n, C) logits blocks resident.

    out = pl.pallas_call(
        kernel,
        out_shape=jax.ShapeDtypeStruct((num_splits * 8, _LANE), jnp.float32),
        grid=(num_splits, tiles_per_split),
        in_specs=[
            # logits / target: resident across the whole grid, single-buffered.
            pl.BlockSpec((n, num_classes), const_map, pipeline_mode=resident),
            pl.BlockSpec((n, num_classes), const_map, pipeline_mode=resident),
            pl.BlockSpec((n, 1), const_map, pipeline_mode=resident),
            # attention: streamed lane-dense tiles (default double-buffering; bump to
            # pl.Buffered(3) only if profiling shows exposed DMA waits).
            pl.BlockSpec((block_rows, _LANE), attn_map),
            pl.BlockSpec((block_rows, _LANE), attn_map),
        ],
        out_specs=pl.BlockSpec((8, _LANE), lambda s, i: (s, 0)),
        scratch_shapes=[pltpu.VMEM((block_rows, _LANE), jnp.float32)],
        compiler_params=pltpu.CompilerParams(
            dimension_semantics=("parallel", "arbitrary"),
            vmem_limit_bytes=vmem_limit),
    )(real_logits, fake_logits, t2, rmat, fmat)

    # Per-split partials (split 0 already carries the CE term); one tiny add to combine.
    partials = out.reshape(num_splits, 8, _LANE)[:, 0, 0]
    return jnp.sum(partials)


# ------------------------------ pure-JAX reference --------------------------------
def _critic_loss2_ref(real_preds, fake_preds, target, beta=1e-07, sigma=1.0):
    def ce(logits, t):
        lse = jax.nn.logsumexp(logits, axis=-1)
        picked = jnp.take_along_axis(logits, t[:, None], axis=-1)[:, 0]
        return jnp.mean(lse - picked)

    cls = ce(real_preds[0], target) + ce(fake_preds[0], target)
    latt = jnp.sum(real_preds[2]) + jnp.sum(fake_preds[2])
    return sigma * cls - beta * latt


if __name__ == "__main__":
    key = jax.random.PRNGKey(0)
    k1, k2, k3, k4, k5 = jax.random.split(key, 5)

    N, C = 8, 32                      # batch, number of classes
    ATTN_SHAPE = (N, 4, 32, 32)       # attention pattern: (batch, heads, seq, seq) -> 256 lane-rows

    real_logits = jax.random.normal(k1, (N, C), jnp.float32)
    fake_logits = jax.random.normal(k2, (N, C), jnp.float32)
    target = jax.random.randint(k3, (N,), 0, C, jnp.int32)
    real_attn = jax.random.uniform(k4, ATTN_SHAPE, dtype=jnp.float32)
    fake_attn = jax.random.uniform(k5, ATTN_SHAPE, dtype=jnp.float32)

    # preds tuples: [0] = logits, [1] = unused, [2] = attention pattern
    real_preds = (real_logits, None, real_attn)
    fake_preds = (fake_logits, None, fake_attn)

    # block_rows=96 deliberately exercises multi-tile streaming, the 2-way "parallel"
    # split, the gated ragged-tile mask and the clamped fully-masked tile in one run.
    loss = critic_loss2(real_preds, fake_preds, target, beta=1e-07, sigma=1.0,
                        block_rows=96, num_splits=2)
    loss = jax.block_until_ready(loss)

    ref = _critic_loss2_ref(real_preds, fake_preds, target, beta=1e-07, sigma=1.0)
    assert jnp.allclose(loss, ref, rtol=1e-5, atol=1e-5), (loss, ref)

    print("KERNEL_OK")
</pallas_src>

<mosaic_0001>
module attributes {stable_mosaic.version = 11 : i64} {
  func.func @_critic_loss2_kernel(%arg0: i32, %arg1: i32, %arg2: memref<8x32xf32, #tpu.memory_space<vmem>>, %arg3: memref<8x32xf32, #tpu.memory_space<vmem>>, %arg4: memref<8x1xi32, #tpu.memory_space<vmem>>, %arg5: memref<96x128xf32, #tpu.memory_space<vmem>>, %arg6: memref<96x128xf32, #tpu.memory_space<vmem>>, %arg7: memref<8x128xf32, #tpu.memory_space<vmem>>, %arg8: memref<96x128xf32, #tpu.memory_space<vmem>>) attributes {dimension_semantics = [#tpu.dimension_semantics<parallel>, #tpu.dimension_semantics<arbitrary>], iteration_bounds = array<i64: 2, 2>, scalar_prefetch = 0 : i64, scratch_operands = 1 : i64, tpu.core_type = #tpu.core_type<tc>, window_params = [{pipeline_mode = #tpu.pipeline_mode<synchronous>, transform_indices = @transform_0, window_bounds = array<i64: 8, 32>}, {pipeline_mode = #tpu.pipeline_mode<synchronous>, transform_indices = @transform_1, window_bounds = array<i64: 8, 32>}, {pipeline_mode = #tpu.pipeline_mode<synchronous>, transform_indices = @transform_2, window_bounds = array<i64: 8, 1>}, {transform_indices = @transform_3, window_bounds = array<i64: 96, 128>}, {transform_indices = @transform_4, window_bounds = array<i64: 96, 128>}, {transform_indices = @transform_5, window_bounds = array<i64: 8, 128>}]} {
    %c2_i32 = arith.constant 2 : i32
    %0 = arith.muli %arg0, %c2_i32 : i32
    %1 = arith.addi %0, %arg1 : i32
    %c0 = arith.constant 0 : index
    %c0_0 = arith.constant 0 : index
    %2 = vector.load %arg5[%c0, %c0_0] : memref<96x128xf32, #tpu.memory_space<vmem>>, vector<96x128xf32>
    %c0_1 = arith.constant 0 : index
    %c0_2 = arith.constant 0 : index
    %3 = vector.load %arg6[%c0_1, %c0_2] : memref<96x128xf32, #tpu.memory_space<vmem>>, vector<96x128xf32>
    %4 = arith.addf %2, %3 : vector<96x128xf32>
    %c2_i32_3 = arith.constant 2 : i32
    %5 = arith.cmpi slt, %1, %c2_i32_3 : i32
    %6 = arith.extui %5 : i1 to i32
    %c0_i32 = arith.constant 0 : i32
    %7 = arith.cmpi ne, %6, %c0_i32 : i32
    scf.if %7 {
      %c0_i32_7 = arith.constant 0 : i32
      %14 = arith.cmpi eq, %arg1, %c0_i32_7 : i32
      %15 = arith.extui %14 : i1 to i32
      %c0_i32_8 = arith.constant 0 : i32
      %16 = arith.cmpi ne, %15, %c0_i32_8 : i32
      scf.if %16 {
        %c0_11 = arith.constant 0 : index
        %c0_12 = arith.constant 0 : index
        %20 = vector.load %arg8[%c0_11, %c0_12] : memref<96x128xf32, #tpu.memory_space<vmem>>, vector<96x128xf32>
        tpu.vector_store %arg8[%c0_11, %c0_12], %4 {strides = array<i32>} : memref<96x128xf32, #tpu.memory_space<vmem>>, vector<96x128xf32>,
      } else {
      }
      %c0_i32_9 = arith.constant 0 : i32
      %17 = arith.cmpi sgt, %arg1, %c0_i32_9 : i32
      %18 = arith.extui %17 : i1 to i32
      %c0_i32_10 = arith.constant 0 : i32
      %19 = arith.cmpi ne, %18, %c0_i32_10 : i32
      scf.if %19 {
        %c0_11 = arith.constant 0 : index
        %c0_12 = arith.constant 0 : index
        %20 = vector.load %arg8[%c0_11, %c0_12] : memref<96x128xf32, #tpu.memory_space<vmem>>, vector<96x128xf32>
        %21 = arith.addf %20, %4 : vector<96x128xf32>
        %c0_13 = arith.constant 0 : index
        %c0_14 = arith.constant 0 : index
        %22 = vector.load %arg8[%c0_13, %c0_14] : memref<96x128xf32, #tpu.memory_space<vmem>>, vector<96x128xf32>
        tpu.vector_store %arg8[%c0_13, %c0_14], %21 {strides = array<i32>} : memref<96x128xf32, #tpu.memory_space<vmem>>, vector<96x128xf32>,
      } else {
      }
    } else {
    }
    %c2_i32_4 = arith.constant 2 : i32
    %8 = arith.cmpi sge, %1, %c2_i32_4 : i32
    %9 = arith.extui %8 : i1 to i32
    %c0_i32_5 = arith.constant 0 : i32
    %10 = arith.cmpi ne, %9, %c0_i32_5 : i32
    scf.if %10 {
      %c96_i32 = arith.constant 96 : i32
      %14 = arith.muli %1, %c96_i32 : i32
      %15 = tpu.iota {dimensions = array<i32: 0>} : vector<96x128xi32>
      %16 = vector.broadcast %14 : i32 to vector<96x128xi32>
      %17 = arith.addi %16, %15 : vector<96x128xi32>
      %c256_i32 = arith.constant 256 : i32
      %18 = vector.broadcast %c256_i32 : i32 to vector<96x128xi32>
      %19 = arith.cmpi slt, %17, %18 : vector<96x128xi32>
      %cst = arith.constant 0.000000e+00 : f32
      %20 = vector.broadcast %cst : f32 to vector<96x128xf32>
      %21 = arith.select %19, %4, %20 : vector<96x128xi1>, vector<96x128xf32>
      %c0_i32_7 = arith.constant 0 : i32
      %22 = arith.cmpi eq, %arg1, %c0_i32_7 : i32
      %23 = arith.extui %22 : i1 to i32
      %c0_i32_8 = arith.constant 0 : i32
      %24 = arith.cmpi ne, %23, %c0_i32_8 : i32
      scf.if %24 {
        %c0_11 = arith.constant 0 : index
        %c0_12 = arith.constant 0 : index
        %28 = vector.load %arg8[%c0_11, %c0_12] : memref<96x128xf32, #tpu.memory_space<vmem>>, vector<96x128xf32>
        tpu.vector_store %arg8[%c0_11, %c0_12], %21 {strides = array<i32>} : memref<96x128xf32, #tpu.memory_space<vmem>>, vector<96x128xf32>,
      } else {
      }
      %c0_i32_9 = arith.constant 0 : i32
      %25 = arith.cmpi sgt, %arg1, %c0_i32_9 : i32
      %26 = arith.extui %25 : i1 to i32
      %c0_i32_10 = arith.constant 0 : i32
      %27 = arith.cmpi ne, %26, %c0_i32_10 : i32
      scf.if %27 {
        %c0_11 = arith.constant 0 : index
        %c0_12 = arith.constant 0 : index
        %28 = vector.load %arg8[%c0_11, %c0_12] : memref<96x128xf32, #tpu.memory_space<vmem>>, vector<96x128xf32>
        %29 = arith.addf %28, %21 : vector<96x128xf32>
        %c0_13 = arith.constant 0 : index
        %c0_14 = arith.constant 0 : index
        %30 = vector.load %arg8[%c0_13, %c0_14] : memref<96x128xf32, #tpu.memory_space<vmem>>, vector<96x128xf32>
        tpu.vector_store %arg8[%c0_13, %c0_14], %29 {strides = array<i32>} : memref<96x128xf32, #tpu.memory_space<vmem>>, vector<96x128xf32>,
      } else {
      }
    } else {
    }
    %c1_i32 = arith.constant 1 : i32
    %11 = arith.cmpi eq, %arg1, %c1_i32 : i32
    %12 = arith.extui %11 : i1 to i32
    %c0_i32_6 = arith.constant 0 : i32
    %13 = arith.cmpi ne, %12, %c0_i32_6 : i32
    scf.if %13 {
      %cst = arith.constant 0.000000e+00 : f32
      %cst_7 = arith.constant 1.000000e-07 : f32
      %14 = arith.subf %cst, %cst_7 : f32
      %c0_8 = arith.constant 0 : index
      %c0_9 = arith.constant 0 : index
      %15 = vector.load %arg8[%c0_8, %c0_9] : memref<96x128xf32, #tpu.memory_space<vmem>>, vector<96x128xf32>
      %16 = vector.shape_cast %15 : vector<96x128xf32> to vector<1x96x128xf32>
      %cst_10 = arith.constant dense<0.000000e+00> : vector<1xf32>
      %17 = vector.multi_reduction <add>, %16, %cst_10 [1, 2] : vector<1x96x128xf32> to vector<1xf32>
      %18 = vector.shape_cast %17 : vector<1xf32> to vector<1x1x1xf32>
      %19 = vector.extract %18[0, 0, 0] : f32 from vector<1x1x1xf32>
      %20 = arith.mulf %14, %19 : f32
      %c0_i32_11 = arith.constant 0 : i32
      %21 = arith.cmpi eq, %arg0, %c0_i32_11 : i32
      %22 = arith.extui %21 : i1 to i32
      %c0_i32_12 = arith.constant 0 : i32
      %23 = arith.cmpi ne, %22, %c0_i32_12 : i32
      scf.if %23 {
        %c0_15 = arith.constant 0 : index
        %c0_16 = arith.constant 0 : index
        %27 = vector.load %arg4[%c0_15, %c0_16] : memref<8x1xi32, #tpu.memory_space<vmem>>, vector<8x1xi32>
        %c0_17 = arith.constant 0 : index
        %c0_18 = arith.constant 0 : index
        %28 = vector.load %arg2[%c0_17, %c0_18] : memref<8x32xf32, #tpu.memory_space<vmem>>, vector<8x32xf32>
        %cst_19 = arith.constant dense<0xFF800000> : vector<8xf32>
        %29 = vector.multi_reduction <maximumf>, %28, %cst_19 [1] : vector<8x32xf32> to vector<8xf32>
        %30 = vector.shape_cast %29 : vector<8xf32> to vector<8x1xf32>
        %31 = vector.broadcast %30 : vector<8x1xf32> to vector<8x32xf32>
        %32 = arith.subf %28, %31 : vector<8x32xf32>
        %33 = math.exp %32 : vector<8x32xf32>
        %cst_20 = arith.constant dense<0.000000e+00> : vector<8xf32>
        %34 = vector.multi_reduction <add>, %33, %cst_20 [1] : vector<8x32xf32> to vector<8xf32>
        %35 = vector.shape_cast %34 : vector<8xf32> to vector<8x1xf32>
        %36 = math.log %35 : vector<8x1xf32>
        %37 = tpu.iota {dimensions = array<i32: 1>} : vector<8x32xi32>
        %38 = vector.broadcast %27 : vector<8x1xi32> to vector<8x32xi32>
        %39 = arith.cmpi eq, %37, %38 : vector<8x32xi32>
        %cst_21 = arith.constant 0.000000e+00 : f32
        %40 = vector.broadcast %cst_21 : f32 to vector<8x32xf32>
        %41 = arith.select %39, %32, %40 : vector<8x32xi1>, vector<8x32xf32>
        %cst_22 = arith.constant dense<0.000000e+00> : vector<8xf32>
        %42 = vector.multi_reduction <add>, %41, %cst_22 [1] : vector<8x32xf32> to vector<8xf32>
        %43 = vector.shape_cast %42 : vector<8xf32> to vector<8x1xf32>
        %44 = arith.subf %36, %43 : vector<8x1xf32>
        %45 = vector.shape_cast %44 : vector<8x1xf32> to vector<1x8x1xf32>
        %cst_23 = arith.constant dense<0.000000e+00> : vector<1xf32>
        %46 = vector.multi_reduction <add>, %45, %cst_23 [1, 2] : vector<1x8x1xf32> to vector<1xf32>
        %47 = vector.shape_cast %46 : vector<1xf32> to vector<1x1x1xf32>
        %48 = vector.extract %47[0, 0, 0] : f32 from vector<1x1x1xf32>
        %c0_24 = arith.constant 0 : index
        %c0_25 = arith.constant 0 : index
        %49 = vector.load %arg3[%c0_24, %c0_25] : memref<8x32xf32, #tpu.memory_space<vmem>>, vector<8x32xf32>
        %cst_26 = arith.constant dense<0xFF800000> : vector<8xf32>
        %50 = vector.multi_reduction <maximumf>, %49, %cst_26 [1] : vector<8x32xf32> to vector<8xf32>
        %51 = vector.shape_cast %50 : vector<8xf32> to vector<8x1xf32>
        %52 = vector.broadcast %51 : vector<8x1xf32> to vector<8x32xf32>
        %53 = arith.subf %49, %52 : vector<8x32xf32>
        %54 = math.exp %53 : vector<8x32xf32>
        %cst_27 = arith.constant dense<0.000000e+00> : vector<8xf32>
        %55 = vector.multi_reduction <add>, %54, %cst_27 [1] : vector<8x32xf32> to vector<8xf32>
        %56 = vector.shape_cast %55 : vector<8xf32> to vector<8x1xf32>
        %57 = math.log %56 : vector<8x1xf32>
        %58 = tpu.iota {dimensions = array<i32: 1>} : vector<8x32xi32>
        %59 = vector.broadcast %27 : vector<8x1xi32> to vector<8x32xi32>
        %60 = arith.cmpi eq, %58, %59 : vector<8x32xi32>
        %cst_28 = arith.constant 0.000000e+00 : f32
        %61 = vector.broadcast %cst_28 : f32 to vector<8x32xf32>
        %62 = arith.select %60, %53, %61 : vector<8x32xi1>, vector<8x32xf32>
        %cst_29 = arith.constant dense<0.000000e+00> : vector<8xf32>
        %63 = vector.multi_reduction <add>, %62, %cst_29 [1] : vector<8x32xf32> to vector<8xf32>
        %64 = vector.shape_cast %63 : vector<8xf32> to vector<8x1xf32>
        %65 = arith.subf %57, %64 : vector<8x1xf32>
        %66 = vector.shape_cast %65 : vector<8x1xf32> to vector<1x8x1xf32>
        %cst_30 = arith.constant dense<0.000000e+00> : vector<1xf32>
        %67 = vector.multi_reduction <add>, %66, %cst_30 [1, 2] : vector<1x8x1xf32> to vector<1xf32>
        %68 = vector.shape_cast %67 : vector<1xf32> to vector<1x1x1xf32>
        %69 = vector.extract %68[0, 0, 0] : f32 from vector<1x1x1xf32>
        %70 = arith.addf %48, %69 : f32
        %cst_31 = arith.constant 1.000000e+00 : f32
        %71 = arith.mulf %cst_31, %70 : f32
        %cst_32 = arith.constant 8.000000e+00 : f32
        %72 = arith.divf %71, %cst_32 : f32
        %73 = arith.addf %20, %72 : f32
        %74 = vector.broadcast %73 : f32 to vector<8x128xf32>
        %c0_33 = arith.constant 0 : index
        %c0_34 = arith.constant 0 : index
        %75 = vector.load %arg7[%c0_33, %c0_34] : memref<8x128xf32, #tpu.memory_space<vmem>>, vector<8x128xf32>
        tpu.vector_store %arg7[%c0_33, %c0_34], %74 {strides = array<i32>} : memref<8x128xf32, #tpu.memory_space<vmem>>, vector<8x128xf32>,
      } else {
      }
      %c0_i32_13 = arith.constant 0 : i32
      %24 = arith.cmpi ne, %arg0, %c0_i32_13 : i32
      %25 = arith.extui %24 : i1 to i32
      %c0_i32_14 = arith.constant 0 : i32
      %26 = arith.cmpi ne, %25, %c0_i32_14 : i32
      scf.if %26 {
        %27 = vector.broadcast %20 : f32 to vector<8x128xf32>
        %c0_15 = arith.constant 0 : index
        %c0_16 = arith.constant 0 : index
        %28 = vector.load %arg7[%c0_15, %c0_16] : memref<8x128xf32, #tpu.memory_space<vmem>>, vector<8x128xf32>
        tpu.vector_store %arg7[%c0_15, %c0_16], %27 {strides = array<i32>} : memref<8x128xf32, #tpu.memory_space<vmem>>, vector<8x128xf32>,
      } else {
      }
    } else {
    }
    return
  }
  func.func @transform_0(%arg0: i32, %arg1: i32) -> (i32, i32) {
    %c0_i32 = arith.constant 0 : i32
    %c0_i32_0 = arith.constant 0 : i32
    %c0_i32_1 = arith.constant 0 : i32
    return %c0_i32, %c0_i32_0 : i32, i32
  }
  func.func @transform_1(%arg0: i32, %arg1: i32) -> (i32, i32) {
    %c0_i32 = arith.constant 0 : i32
    %c0_i32_0 = arith.constant 0 : i32
    %c0_i32_1 = arith.constant 0 : i32
    return %c0_i32, %c0_i32_0 : i32, i32
  }
  func.func @transform_2(%arg0: i32, %arg1: i32) -> (i32, i32) {
    %c0_i32 = arith.constant 0 : i32
    %c0_i32_0 = arith.constant 0 : i32
    %c0_i32_1 = arith.constant 0 : i32
    return %c0_i32, %c0_i32_0 : i32, i32
  }
  func.func @transform_3(%arg0: i32, %arg1: i32) -> (i32, i32) {
    %c2_i32 = arith.constant 2 : i32
    %0 = arith.muli %arg0, %c2_i32 : i32
    %1 = arith.addi %0, %arg1 : i32
    %c2_i32_0 = arith.constant 2 : i32
    %2 = arith.minsi %1, %c2_i32_0 : i32
    %c0_i32 = arith.constant 0 : i32
    %c0_i32_1 = arith.constant 0 : i32
    return %2, %c0_i32 : i32, i32
  }
  func.func @transform_4(%arg0: i32, %arg1: i32) -> (i32, i32) {
    %c2_i32 = arith.constant 2 : i32
    %0 = arith.muli %arg0, %c2_i32 : i32
    %1 = arith.addi %0, %arg1 : i32
    %c2_i32_0 = arith.constant 2 : i32
    %2 = arith.minsi %1, %c2_i32_0 : i32
    %c0_i32 = arith.constant 0 : i32
    %c0_i32_1 = arith.constant 0 : i32
    return %2, %c0_i32 : i32, i32
  }
  func.func @transform_5(%arg0: i32, %arg1: i32) -> (i32, i32) {
    %c0_i32 = arith.constant 0 : i32
    %c0_i32_0 = arith.constant 0 : i32
    return %arg0, %c0_i32 : i32, i32
  }
}

</mosaic_0001>

<bundles_post_ra>
// kernel: tpu_custom_call.1
= control target key start
LH: loop header
LB: loop body
LE: loop exit
PB: predicated region body
PF: predicated region fallthrough
CT: control target
= control target key end

     0   :  { %s1648_s0 = inlined_call_operand.vmem [shape: f32[8,32], index: 0, kind: input, shape index: {}]   ;;  %s1649_s1 = inlined_call_operand.hbm [shape: f32[8,32], index: 1, kind: input, shape index: {}]   ;;  %s1650_s2 = inlined_call_operand.vmem [shape: s32[8,1], index: 2, kind: input, shape index: {}]   ;;  %s1651_s3 = inlined_call_operand.hbm [shape: f32[256,128], index: 3, kind: input, shape index: {}]   ;;  %s1652_s4 = inlined_call_operand.hbm [shape: f32[256,128], index: 4, kind: input, shape index: {}]   ;;  %s1653_s5 = inlined_call_operand.hbm [shape: f32[16,128], index: 5, kind: output, shape index: {}]  }
   0x1   :  { %1664 = sst [smem:[#allocation21_spill]] %s1649_s1 }
   0x2   :  { %1665 = sst [smem:[#allocation22_spill]] %s1651_s3 }
   0x3   :  { %10 = vsyncpa [#allocation4], 0 }
   0x4   :  { %11 = vsyncpa [#allocation7], 0 }
   0x5   :  { %13 = vsyncpa [#allocation7 + $0x1], 0 }
   0x6   :  { %14 = vsyncpa [#allocation5], 0 }
   0x7   :  { %16 = vsyncpa [#allocation5 + $0x1], 0  ;;  %s1235_s18 = smov 0   ;;  %s1237_s19 = smov 0  }
   0x8   :  { %s1239_s20 = smov 0   ;;  %s1241_s21 = smov 0  }
   0x9   :  { %s1243_s22 = smov 0   ;;  %s1245_s23 = smov 0  }
   0xa   :  { %s1247_s24 = smov 0   ;;  %s1249_s25 = smov 0  }
   0xb   :  { %s1251_s26 = smov 0   ;;  %s1253_s27 = smov 0  }
   0xc   :  { %s1255_s28 = smov 0  }
   0xd LB: > { %1666 = sst [smem:[#allocation13_spill]] %s1162_s20  ;;  %s1291_s29 = sadd.s32 4294967295, %s1194_s28   ;;  %s1194_s28 = sphi %s1255_s28, %s22_s28   ;;  %s1190_s27 = sphi %s1253_s27, %s1697_s27   ;;  %s1186_s26 = sphi %s1251_s26, %s1696_s26   ;;  %s1182_s25 = sphi %s1249_s25, %s1695_s25   ;;  %s1178_s24 = sphi %s1247_s24, %s1694_s24   ;;  %s1174_s23 = sphi %s1245_s23, %s1702_s23   ;;  %s1170_s22 = sphi %s1243_s22, %s1701_s22   ;;  %s1166_s21 = sphi %s1241_s21, %s1700_s21   ;;  %s1162_s20 = sphi %s1239_s20, %s1692_s20   ;;  %s1158_s19 = sphi %s1237_s19, %s1699_s19   ;;  %s1154_s18 = sphi %s1235_s18, %s1698_s18  }
   0xe   : > { %1667 = sst [smem:[#allocation14_spill]] %s1186_s26  ;;  %s813_s30 = sadd.s32 4294967294, %s1194_s28  }
   0xf   : > { %1668 = sst [smem:[#allocation15_spill]] %s1190_s27  ;;  %s31_s6 = sadd.s32 1, %s1186_s26 }
  0x10   : > { %s34_s7 = sadd.s32 1, %s1190_s27  ;;  %p32_p0 = scmp.ge.s32.totalorder %s31_s6, 2 }
  0x11   : > { %s814_s8 = sshll.u32 %s1190_s27, 1  ;;  %s112_s10 = sadd.s32 1, %s1174_s23 }
  0x12   : > { %s102_s9 = sadd.s32 %s1186_s26, %s814_s8  ;;  %s1704_s6 = smov (%p32_p0, %s31_s6), 0 }
  0x13   : > { %1669 = sst [smem:[#allocation16_spill]] %s1704_s6  ;;  %s1706_s7 = smov (!%p32_p0, %s34_s7), %s1190_s27 }
  0x14   : > { %p103_p1 = scmp.lt.s32.totalorder %s102_s9, 2  ;;  %p119_p2 = scmp.ne.s32.totalorder %s1174_s23, %s1170_s22 }
  0x15   : > { %p36_p3 = scmp.ge.s32.totalorder %s1706_s7, 2  ;;  %p120_p4 = scmp.eq.s32.totalorder %s1194_s28, 0 }
  0x16   : > { %s1708_s9 = smov (!%p103_p1, %s102_s9), 2  ;;  %p125_p6 = scmp.ne.s32.totalorder %s1170_s22, %s1166_s21 }
  0x17   : > { %s1710_s7 = smov (%p36_p3, %s1706_s7), 0  ;;  %p1309_p5 = por %p120_p4, %p119_p2 }
  0x18   : > { %1670 = sst [smem:[#allocation17_spill]] %s1710_s7  ;;  %s815_s12 = sshll.u32 %s1710_s7, 1 }
  0x19   : > { %s1671_s11 = scalar_select %p1309_p5, 1, 0 }
  0x1a   : > { %p1658_p7 = scmp.eq.s32.totalorder %s1291_s29, 0  ;;  %s106_s13 = sadd.s32 %s815_s12, %s1704_s6 }
  0x1b   : > { %s169_s14 = ssub.s32 %s1190_s27, %s1710_s7  ;;  %p107_p8 = scmp.lt.s32.totalorder %s106_s13, 2 }
  0x1c   : > { %p1322_p9 = por %p1658_p7, %p125_p6  ;;  %p170_p10 = scmp.eq.s32.totalorder %s169_s14, 0 }
  0x1d   : > { %s172_s16 = sadd.s32 1, %s1162_s20  ;;  %s1712_s13 = smov (!%p107_p8, %s106_s13), 2 }
  0x1e   : > { %s1672_s15 = scalar_select %p1322_p9, 1, 0 }
  0x1f   : > { %s1328_s17 = scalar_select %p170_p10, %s1162_s20, %s172_s16  }
  0x20   : > { %s109_s21 = ssub.s32 %s1708_s9, %s1712_s13  ;;  %p182_p11 = scmp.ne.s32.totalorder %s1162_s20, %s1158_s19 }
  0x21   : > { %1673 = sst [smem:[#allocation18_spill]] %s1328_s17  ;;  %p110_p12 = scmp.eq.s32.totalorder %s109_s21, 0 }
  0x22   : > { %p183_p13 = scmp.eq.s32.totalorder %s1291_s29, 3  ;;  %p188_p0 = scmp.ne.s32.totalorder %s1158_s19, %s1154_s18 }
  0x23   : > { %p189_p1 = scmp.eq.s32.totalorder %s813_s30, 3  ;;  %p818_p4 = scmp.ge.s32.totalorder %s1194_s28, 1 }
  0x24   : > { %s1339_s8 = scalar_select %p110_p12, %s1174_s23, %s112_s10  }
  0x25   : > { %p1341_p2 = por %p183_p13, %p182_p11  ;;  %p1345_p3 = por %p189_p1, %p188_p0 }
  0x26   : > { %1674 = sst [smem:[#allocation19_spill]] %s1339_s8  ;;  %p196_p6 = scmp.lt.s32.totalorder %s1194_s28, 5 }
  0x27   : > { %s1675_s12 = scalar_select %p1341_p2, 1, 0 }
  0x28   : > { %s1676_s14 = scalar_select %p1345_p3, 1, 0 }
  0x29   : > { %p1351_p8 = pnand %p818_p4, %p196_p6  ;;  %s1196_s16 = smov [#allocation3]  }
  0x2a   : > { %1677 = sst [smem:[#allocation20_spill]] %s1676_s14  ;;  %s212_s21 = sshll.u32 %s1196_s16, 4  ;;  %s213_s21 = int_to_ptr.vmem [resolvable:$true] %s212_s21 }
  0x2b   : > { %s1678_s13 = scalar_select %p1351_p8, 1, 0 }
  0x2c   : > { %p869_p10 = pneg %p1351_p8  ;;  %s1680_s1 = sld [smem:[#allocation21_spill]] }
  0x2e   : > { %p1359_p11 = pnand %p869_p10, %p1658_p7 }
  0x30   : > { %p986_p13 = pneg %p1359_p11 }
  0x32   : > { %s984_s6 = scalar_lea.hbm %s1680_s1, 128 }
  0x33   : > { %p985_p12 = scmp.ne.s32.totalorder %s1680_s1, %s984_s6  ;;  %p991_p4 = scmp.lt.u32.totalorder %s984_s6, %s1680_s1 }
  0x35   : > { %p987_p0 = pnand %p986_p13, %p985_p12 }
  0x37   : > { %p988_p1 = pneg %p987_p0 }
  0x39   : > { %p993_p6 = pnand %p991_p4, %p988_p1 }
  0x3b   : > { %996 = shalt.err (!%p993_p6)
}
  0x3c   : > { %s997_s17 = scalar_lea.vmem %s213_s21, 128  ;;  %p1005_p2 = scmp.lt.s32.totalorder %s213_s21, %s213_s21 }
  0x3d   : > { %p998_p10 = scmp.ne.s32.totalorder %s213_s21, %s997_s17  ;;  %p1006_p9 = scmp.lt.s32.totalorder %s997_s17, %s997_s17 }
  0x3f   : > { %p1000_p7 = pnand %p998_p10, %p986_p13  ;;  %p1007_p8 = por %p1006_p9, %p1005_p2 }
  0x41   : > { %p1001_p3 = pneg %p1000_p7 }
  0x43   : > { %p1008_p5 = pnand %p1007_p8, %p1001_p3 }
  0x45   : > { %1011 = shalt.err (!%p1008_p5)
}
  0x46   : > { %872 = dma.hbm_to_vmem [thread:$0]  (!%p1359_p11), %s1680_s1, 128, %s213_s21, [#allocation4]  }
  0x47   : > { %p820_p12 = scmp.ge.s32.totalorder %s1194_s28, 4 }
  0x48   : > { %p1681_p0 = scmp.ne.s32.totalorder (!%p820_p12), %s1671_s11, 0 }
  0x49   : > { %222 = sbr.rel (%p820_p12) target bundleno = 157 (0x9d), region = 28 }
  0x50   : > { %225 = sbr.rel (!%p1681_p0) target bundleno = 120 (0x78), region = 32  ;;  %s226_s6 = sand.u32 (%p1681_p0), 1, %s1194_s28  }
  0x51   : > { %s228_s7 = sand.u32 (%p1681_p0), 1, %s1174_s23   ;;  %s235_s8 = smul.u32 (%p1681_p0), 12, %s1708_s9 }
  0x52   : > { %s852_s17 = smul.u32 (%p1681_p0), 96, %s228_s7  ;;  %s1388_s16 = scalar_lea.sflag (%p1681_p0), [#allocation7], %s226_s6 }
  0x53   : > { %s236_s10 = ssub.s32 (%p1681_p0), 32, %s235_s8 }
  0x54   : > { %p237_p5 = scmp.lt.s32.totalorder (%p1681_p0), %s236_s10, 12  ;;  %s230_s26 = scalar_lea.vmem (%p1681_p0), [#allocation6], %s852_s17 }
  0x57   : > { %s1714_s10 = smov (!%p237_p5, %s236_s10), 12 }
  0x58   : > { %s1385_s30 = sshll.u32 %s1714_s10, 7 }
  0x59   : > { %s241_s21 = ssub.s32 1536, %s1385_s30 }
  0x5a   : > { %242 = vsyncadd %s1388_s16, %s241_s21  ;;  %p823_p7 = scmp.ne.s32.totalorder %s1385_s30, 0  ;;  %s850_s27 = smul.u32 1536, %s1708_s9 }
  0x5b   : > { %s247_s7 = sshll.u32 %s230_s26, 4  ;;  %s1682_s3 = sld [smem:[#allocation22_spill]]  ;;  %s1398_s7 = int_to_ptr.vmem [resolvable:$true] %s247_s7 }
  0x61   : > { %s1396_s20 = scalar_lea.hbm %s1682_s3, %s850_s27  ;;  %s1016_s21 = scalar_lea.hbm %s1682_s3, 4096 }
  0x62   : > { %s1012_s6 = scalar_lea.hbm %s1396_s20, %s1385_s30  ;;  %p1017_p8 = scmp.lt.u32.totalorder %s1396_s20, %s1682_s3 }
  0x63   : > { %p1013_p9 = scmp.ne.s32.totalorder %s1396_s20, %s1012_s6  ;;  %p1018_p11 = scmp.lt.u32.totalorder %s1016_s21, %s1012_s6 }
  0x64   : > { %p1020_p1 = scmp.lt.u32.totalorder %s1012_s6, %s1396_s20 }
  0x65   : > { %p1014_p2 = pnand %p1013_p9, %p823_p7  ;;  %p1019_p13 = por %p1018_p11, %p1017_p8 }
  0x67   : > { %p1015_p3 = pneg %p1014_p2  ;;  %p1021_p4 = por %p1020_p1, %p1019_p13 }
  0x69   : > { %p1022_p6 = pnand %p1021_p4, %p1015_p3 }
  0x6b   : > { %1025 = shalt.err (!%p1022_p6)
}
  0x6c   : > { %s1026_s1 = scalar_lea.vmem %s1398_s7, %s1385_s30  ;;  %s1197_s27 = smov [#allocation6]  }
  0x6d   : > { %p1027_p10 = scmp.ne.s32.totalorder %s1398_s7, %s1026_s1  ;;  %s1030_s8 = sshll.u32 %s1197_s27, 4  ;;  %s1031_s8 = int_to_ptr.vmem [resolvable:$false] %s1030_s8 }
  0x6e   : > { %s1032_s14 = scalar_lea.vmem %s1031_s8, 3072  ;;  %p1033_p5 = scmp.lt.s32.totalorder %s1398_s7, %s1031_s8 }
  0x6f   : > { %p1028_p12 = pnand %p1027_p10, %p823_p7  ;;  %p1034_p9 = scmp.lt.s32.totalorder %s1032_s14, %s1026_s1 }
  0x71   : > { %p1029_p0 = pneg %p1028_p12  ;;  %p1035_p2 = por %p1034_p9, %p1033_p5 }
  0x73   : > { %p1036_p8 = pnand %p1035_p2, %p1029_p0 }
  0x75   : > { %1039 = shalt.err (!%p1036_p8)
}
  0x76   : > { %s1198_s6 = smov 128   ;;  %s1199_s17 = smov 8  }
  0x77   : > { %253 = dma.hbm_to_vmem [thread:$0]  (%p823_p7), %s1396_s20, %s1385_s30, %s1398_s7, %s1388_s16, %s1198_s6, %s1198_s6, %s1199_s17  }
  0x78 PF: > { %p1683_p3 = scmp.ne.s32.totalorder %s1671_s11, 0 }
  0x79   : > { %s257_s10 = sand.u32 (%p1683_p3), 1, %s1194_s28   ;;  %s259_s21 = sand.u32 (%p1683_p3), 1, %s1174_s23  }
  0x7a   : > { %256 = sbr.rel (!%p1683_p3) target bundleno = 157 (0x9d), region = 36  ;;  %s1433_s3 = scalar_lea.sflag (%p1683_p3), [#allocation7], %s257_s10 }
  0x7b   : > { %s853_s26 = smul.u32 (%p1683_p3), 96, %s259_s21 }
  0x7c   : > { %s266_s1 = smul.u32 (%p1683_p3), 12, %s1708_s9 }
  0x7d   : > { %s261_s20 = scalar_lea.vmem (%p1683_p3), [#allocation8], %s853_s26 }
  0x7e   : > { %s267_s27 = ssub.s32 (%p1683_p3), 32, %s266_s1 }
  0x7f   : > { %p268_p11 = scmp.lt.s32.totalorder (%p1683_p3), %s267_s27, 12 }
  0x81   : > { %s1716_s27 = smov (!%p268_p11, %s267_s27), 12 }
  0x82   : > { %s1430_s8 = sshll.u32 %s1716_s27, 7 }
  0x83   : > { %s272_s14 = ssub.s32 1536, %s1430_s8 }
  0x84   : > { %273 = vsyncadd %s1433_s3, %s272_s14  ;;  %p829_p7 = scmp.ne.s32.totalorder %s1430_s8, 0  ;;  %s851_s11 = smul.u32 1536, %s1708_s9 }
  0x85   : > { %s278_s30 = sshll.u32 %s261_s20, 4  ;;  %s1044_s9 = scalar_lea.hbm %s1652_s4, 4096  ;;  %s1443_s30 = int_to_ptr.vmem [resolvable:$true] %s278_s30 }
  0x86   : > { %s1441_s6 = scalar_lea.hbm %s1652_s4, %s851_s11 }
  0x87   : > { %s1040_s17 = scalar_lea.hbm %s1441_s6, %s1430_s8  ;;  %p1045_p6 = scmp.lt.u32.totalorder %s1441_s6, %s1652_s4 }
  0x88   : > { %p1041_p13 = scmp.ne.s32.totalorder %s1441_s6, %s1040_s17  ;;  %p1046_p10 = scmp.lt.u32.totalorder %s1044_s9, %s1040_s17 }
  0x89   : > { %p1048_p0 = scmp.lt.u32.totalorder %s1040_s17, %s1441_s6 }
  0x8a   : > { %p1042_p1 = pnand %p1041_p13, %p829_p7  ;;  %p1047_p12 = por %p1046_p10, %p1045_p6 }
  0x8c   : > { %p1043_p4 = pneg %p1042_p1  ;;  %p1049_p5 = por %p1048_p0, %p1047_p12 }
  0x8e   : > { %p1050_p9 = pnand %p1049_p5, %p1043_p4 }
  0x90   : > { %1053 = shalt.err (!%p1050_p9)
}
  0x91   : > { %s1054_s27 = scalar_lea.vmem %s1443_s30, %s1430_s8  ;;  %s1200_s14 = smov [#allocation8]  }
  0x92   : > { %p1055_p2 = scmp.ne.s32.totalorder %s1443_s30, %s1054_s27  ;;  %s1058_s20 = sshll.u32 %s1200_s14, 4  ;;  %s1059_s20 = int_to_ptr.vmem [resolvable:$false] %s1058_s20 }
  0x93   : > { %s1060_s11 = scalar_lea.vmem %s1059_s20, 3072  ;;  %p1061_p11 = scmp.lt.s32.totalorder %s1443_s30, %s1059_s20 }
  0x94   : > { %p1056_p8 = pnand %p1055_p2, %p829_p7  ;;  %p1062_p13 = scmp.lt.s32.totalorder %s1060_s11, %s1054_s27 }
  0x96   : > { %p1057_p3 = pneg %p1056_p8  ;;  %p1063_p1 = por %p1062_p13, %p1061_p11 }
  0x98   : > { %p1064_p6 = pnand %p1063_p1, %p1057_p3 }
  0x9a   : > { %1067 = shalt.err (!%p1064_p6)
}
  0x9b   : > { %s1201_s16 = smov 128   ;;  %s1202_s7 = smov 8  }
  0x9c   : > { %284 = dma.hbm_to_vmem [thread:$0]  (%p829_p7), %s1441_s6, %s1430_s8, %s1443_s30, %s1433_s3, %s1201_s16, %s1201_s16, %s1202_s7  }
  0x9d PF: > { %p1684_p4 = scmp.ne.s32.totalorder %s1678_s13, 0 }
  0x9e   : > { %p1685_p10 = scmp.eq.s32.totalorder (!%p1684_p4), %s1291_s29, 0 }
  0x9f   : > { %290 = sbr.rel (%p1684_p4) target bundleno = 835 (0x343), region = 40 }
  0xa6   : > { %1141 = dma.done.wait (%p1685_p10), [#allocation4], 128   ;;  %p1686_p12 = pmov %p1685_p10 }
  0xa7   : > { %s296_s17 = sand.u32 1, %s1291_s29   ;;  %s298_s10 = sand.u32 1, %s1170_s22  }
  0xa8   : > { %1143 = vsyncadd (%p1686_p12), [#allocation4], 4294967168  ;;  %s854_s21 = smul.u32 96, %s298_s10  ;;  %s297_s9 = scalar_lea.sflag [#allocation7], %s296_s17 }
  0xa9   : > { %p1687_p7 = scmp.ne.s32.totalorder %s1672_s15, 0 }
  0xaa   : > { %s300_s26 = scalar_lea.vmem [#allocation6], %s854_s21 }
  0xab   : > { %1145 = dma.done.wait (%p1687_p7), %s297_s9, 3072  }
  0xac   : > { %1147 = vsyncadd (%p1687_p7), %s297_s9, 4294964224  ;;  %s338_s3 = sand.u32 1, %s1158_s19   ;;  %s836_s8 = sshll.u32 %s1182_s25, 1  ;;  %v361_v0 = vld [vmem:[%s300_s26] sm:$0xff]  ;;  %v362_v1 = vld [vmem:[%s300_s26 + $0x8] sm:$0xff] }
  0xad   : > { %s1485_s13 = sshll.u32 %s338_s3, 3  ;;  %s1489_s30 = sadd.s32 %s1178_s24, %s836_s8  ;;  %v363_v2 = vld [vmem:[%s300_s26 + $0x10] sm:$0xff]  ;;  %v364_v3 = vld [vmem:[%s300_s26 + $0x18] sm:$0xff]  ;;  %v365_v4 = vld [vmem:[%s300_s26 + $0x20] sm:$0xff] }
  0xae   : > { %v366_v5 = vld [vmem:[%s300_s26 + $0x28] sm:$0xff]  ;;  %v367_v6 = vld [vmem:[%s300_s26 + $0x30] sm:$0xff]  ;;  %v368_v7 = vld [vmem:[%s300_s26 + $0x38] sm:$0xff]  ;;  %s309_s29 = scalar_lea.vmem [#allocation8], %s854_s21  ;;  %s1516_s15 = scalar_lea.vmem [#allocation9], %s1485_s13 }
  0xaf   : > { %v369_v8 = vld [vmem:[%s300_s26 + $0x40] sm:$0xff]  ;;  %v370_v9 = vld [vmem:[%s300_s26 + $0x48] sm:$0xff]  ;;  %v371_v10 = vld [vmem:[%s300_s26 + $0x50] sm:$0xff]  ;;  %p837_p0 = scmp.ge.s32.totalorder %s1489_s30, 2 }
  0xb0   : > { %v372_v11 = vld [vmem:[%s300_s26 + $0x58] sm:$0xff]  ;;  %v373_v12 = vld [vmem:[%s309_s29] sm:$0xff]  ;;  %v374_v13 = vld [vmem:[%s309_s29 + $0x8] sm:$0xff]  ;;  %p838_p5 = scmp.ne.s32.totalorder (!%p837_p0), %s1178_s24, 0 }
  0xb1   : > { %v375_v14 = vld [vmem:[%s309_s29 + $0x10] sm:$0xff]  ;;  %v376_v15 = vld [vmem:[%s309_s29 + $0x18] sm:$0xff]  ;;  %v377_v16 = vld [vmem:[%s309_s29 + $0x20] sm:$0xff]  ;;  %v1491_v18 = vadd.f32 %v373_v12, %v361_v0  ;;  %v1493_v19 = vadd.f32 %v374_v13, %v362_v1  ;;  %400 = sbr.rel (%p837_p0) target bundleno = 201 (0xc9), region = 56 }
  0xb2   : > { %v378_v17 = vld [vmem:[%s309_s29 + $0x28] sm:$0xff]  ;;  %v1495_v20 = vadd.f32 %v375_v14, %v363_v2  ;;  %v379_v21 = vld [vmem:[%s309_s29 + $0x30] sm:$0xff]  ;;  %v380_v22 = vld [vmem:[%s309_s29 + $0x38] sm:$0xff]  ;;  %v1497_v24 = vadd.f32 %v376_v15, %v364_v3  ;;  %v1499_v25 = vadd.f32 %v377_v16, %v365_v4 }
  0xb3   : > { %v381_v23 = vld [vmem:[%s309_s29 + $0x40] sm:$0xff]  ;;  %v1501_v26 = vadd.f32 %v378_v17, %v366_v5  ;;  %v382_v27 = vld [vmem:[%s309_s29 + $0x48] sm:$0xff]  ;;  %v383_v28 = vld [vmem:[%s309_s29 + $0x50] sm:$0xff]  ;;  %v1503_v30 = vadd.f32 %v379_v21, %v367_v6  ;;  %v1505_v31 = vadd.f32 %v380_v22, %v368_v7 }
  0xb4   : > { %v384_v29 = vld [vmem:[%s309_s29 + $0x58] sm:$0xff]  ;;  %v1507_v32 = vadd.f32 %v381_v23, %v369_v8  ;;  %v1509_v33 = vadd.f32 %v382_v27, %v370_v9  ;;  %v1511_v34 = vadd.f32 %v383_v28, %v371_v10 }
  0xb5   : > { %v1513_v35 = vadd.f32 %v384_v29, %v372_v11 }
  0xb8   : > { %404 = sbr.rel (%p838_p5) target bundleno = 191 (0xbf), region = 60  ;;  %405 = vst [vmem:[#allocation2] sm:$0xff] (!%p838_p5), %v1491_v18  ;;  %406 = vst [vmem:[#allocation2 + $0x8] sm:$0xff] (!%p838_p5), %v1493_v19 }
  0xb9   : > { %407 = vst [vmem:[#allocation2 + $0x10] sm:$0xff] (!%p838_p5), %v1495_v20  ;;  %408 = vst [vmem:[#allocation2 + $0x18] sm:$0xff] (!%p838_p5), %v1497_v24 }
  0xba   : > { %409 = vst [vmem:[#allocation2 + $0x20] sm:$0xff] (!%p838_p5), %v1499_v25  ;;  %410 = vst [vmem:[#allocation2 + $0x28] sm:$0xff] (!%p838_p5), %v1501_v26 }
  0xbb   : > { %411 = vst [vmem:[#allocation2 + $0x30] sm:$0xff] (!%p838_p5), %v1503_v30  ;;  %412 = vst [vmem:[#allocation2 + $0x38] sm:$0xff] (!%p838_p5), %v1505_v31 }
  0xbc   : > { %413 = vst [vmem:[#allocation2 + $0x40] sm:$0xff] (!%p838_p5), %v1507_v32  ;;  %414 = vst [vmem:[#allocation2 + $0x48] sm:$0xff] (!%p838_p5), %v1509_v33 }
  0xbd   : > { %415 = vst [vmem:[#allocation2 + $0x50] sm:$0xff] (!%p838_p5), %v1511_v34  ;;  %416 = vst [vmem:[#allocation2 + $0x58] sm:$0xff] (!%p838_p5), %v1513_v35 }
  0xbf PF: > { %p839_p9 = scmp.le.s32.totalorder %s1178_s24, 0 }
  0xc0   : > { %v421_v36 = vld [vmem:[#allocation2] sm:$0xff] (!%p839_p9)  ;;  %v422_v37 = vld [vmem:[#allocation2 + $0x8] sm:$0xff] (!%p839_p9)  ;;  %v423_v38 = vld [vmem:[#allocation2 + $0x10] sm:$0xff] (!%p839_p9) }
  0xc1   : > { %420 = sbr.rel (%p839_p9) target bundleno = 201 (0xc9), region = 64  ;;  %v433_v39 = vadd.f32 (!%p839_p9), %v421_v36, %v1491_v18  ;;  %v434_v40 = vadd.f32 (!%p839_p9), %v422_v37, %v1493_v19  ;;  %v435_v41 = vadd.f32 (!%p839_p9), %v423_v38, %v1495_v20  ;;  %v424_v42 = vld [vmem:[#allocation2 + $0x18] sm:$0xff] (!%p839_p9)  ;;  %v425_v43 = vld [vmem:[#allocation2 + $0x20] sm:$0xff] (!%p839_p9)  ;;  %v426_v44 = vld [vmem:[#allocation2 + $0x28] sm:$0xff] (!%p839_p9) }
  0xc2   : > { %v436_v45 = vadd.f32 (!%p839_p9), %v424_v42, %v1497_v24  ;;  %v437_v46 = vadd.f32 (!%p839_p9), %v425_v43, %v1499_v25  ;;  %v438_v47 = vadd.f32 (!%p839_p9), %v426_v44, %v1501_v26  ;;  %v427_v48 = vld [vmem:[#allocation2 + $0x30] sm:$0xff] (!%p839_p9)  ;;  %v428_v49 = vld [vmem:[#allocation2 + $0x38] sm:$0xff] (!%p839_p9) }
  0xc3   : > { %v429_v50 = vld [vmem:[#allocation2 + $0x40] sm:$0xff] (!%p839_p9)  ;;  %445 = vst [vmem:[#allocation2] sm:$0xff] (!%p839_p9), %v433_v39  ;;  %446 = vst [vmem:[#allocation2 + $0x8] sm:$0xff] (!%p839_p9), %v434_v40  ;;  %v439_v51 = vadd.f32 (!%p839_p9), %v427_v48, %v1503_v30  ;;  %v440_v52 = vadd.f32 (!%p839_p9), %v428_v49, %v1505_v31  ;;  %v430_v54 = vld [vmem:[#allocation2 + $0x48] sm:$0xff] (!%p839_p9) }
  0xc4   : > { %447 = vst [vmem:[#allocation2 + $0x10] sm:$0xff] (!%p839_p9), %v435_v41  ;;  %v441_v53 = vadd.f32 (!%p839_p9), %v429_v50, %v1507_v32  ;;  %v431_v55 = vld [vmem:[#allocation2 + $0x50] sm:$0xff] (!%p839_p9)  ;;  %v432_v56 = vld [vmem:[#allocation2 + $0x58] sm:$0xff] (!%p839_p9)  ;;  %448 = vst [vmem:[#allocation2 + $0x18] sm:$0xff] (!%p839_p9), %v436_v45  ;;  %v442_v57 = vadd.f32 (!%p839_p9), %v430_v54, %v1509_v33 }
  0xc5   : > { %449 = vst [vmem:[#allocation2 + $0x20] sm:$0xff] (!%p839_p9), %v437_v46  ;;  %450 = vst [vmem:[#allocation2 + $0x28] sm:$0xff] (!%p839_p9), %v438_v47  ;;  %v443_v58 = vadd.f32 (!%p839_p9), %v431_v55, %v1511_v34  ;;  %v444_v59 = vadd.f32 (!%p839_p9), %v432_v56, %v1513_v35 }
  0xc6   : > { %451 = vst [vmem:[#allocation2 + $0x30] sm:$0xff] (!%p839_p9), %v439_v51  ;;  %452 = vst [vmem:[#allocation2 + $0x38] sm:$0xff] (!%p839_p9), %v440_v52 }
  0xc7   : > { %453 = vst [vmem:[#allocation2 + $0x40] sm:$0xff] (!%p839_p9), %v441_v53  ;;  %454 = vst [vmem:[#allocation2 + $0x48] sm:$0xff] (!%p839_p9), %v442_v57 }
  0xc8   : > { %455 = vst [vmem:[#allocation2 + $0x50] sm:$0xff] %v443_v58  ;;  %456 = vst [vmem:[#allocation2 + $0x58] sm:$0xff] %v444_v59 }
  0xc9 PF: > { %p840_p2 = scmp.lt.s32.totalorder %s1489_s30, 2 }
  0xca   : > { %s461_s6 = smul.u32 (!%p840_p2), 96, %s1489_s30  ;;  %v462_v60 = vlaneseq (!%p840_p2)  ;;  %p841_p8 = scmp.ne.s32.totalorder (!%p840_p2), %s1178_s24, 0 }
  0xcb   : > { %460 = sbr.rel (%p840_p2) target bundleno = 236 (0xec), region = 68 }
  0xcc   : > { %v463_v61 = vshrl.u32 (!%p840_p2), %v462_v60, 7  ;;  %v475_v62 = vstv (!%p840_p2), %s461_s6 }
  0xce   : > { %v464_v63 = vadd.s32 (!%p840_p2), 8, %v463_v61  ;;  %v465_v0 = vadd.s32 (!%p840_p2), 16, %v463_v61  ;;  %v466_v1 = vadd.s32 (!%p840_p2), 24, %v463_v61  ;;  %v467_v2 = vadd.s32 (!%p840_p2), 32, %v463_v61 }
  0xcf   : > { %v468_v3 = vadd.s32 (!%p840_p2), 40, %v463_v61  ;;  %v469_v4 = vadd.s32 (!%p840_p2), 48, %v463_v61  ;;  %v470_v5 = vadd.s32 (!%p840_p2), 56, %v463_v61  ;;  %v471_v6 = vadd.s32 (!%p840_p2), 64, %v463_v61 }
  0xd0   : > { %v472_v7 = vadd.s32 (!%p840_p2), 72, %v463_v61  ;;  %v473_v8 = vadd.s32 (!%p840_p2), 80, %v463_v61  ;;  %v474_v9 = vadd.s32 (!%p840_p2), 88, %v463_v61  ;;  %v476_v10 = vadd.s32 (!%p840_p2), %v475_v62, %v463_v61 }
  0xd1   : > { %v477_v11 = vadd.s32 (!%p840_p2), %v475_v62, %v464_v63  ;;  %v478_v12 = vadd.s32 (!%p840_p2), %v475_v62, %v465_v0  ;;  %v479_v13 = vadd.s32 (!%p840_p2), %v475_v62, %v466_v1  ;;  %v480_v14 = vadd.s32 (!%p840_p2), %v475_v62, %v467_v2 }
  0xd2   : > { %v481_v15 = vadd.s32 %v475_v62, %v468_v3  ;;  %v482_v16 = vadd.s32 %v475_v62, %v469_v4  ;;  %v483_v17 = vadd.s32 %v475_v62, %v470_v5  ;;  %v484_v21 = vadd.s32 %v475_v62, %v471_v6 }
  0xd3   : > { %v485_v22 = vadd.s32 %v475_v62, %v472_v7  ;;  %v486_v23 = vadd.s32 %v475_v62, %v473_v8  ;;  %v487_v27 = vadd.s32 %v475_v62, %v474_v9  ;;  %vm488_vm0 = vcmp.lt.s32.totalorder %v476_v10, 256  ;;  %515 = sbr.rel (%p841_p8) target bundleno = 222 (0xde), region = 72 }
  0xd4   : > { %vm489_vm1 = vcmp.lt.s32.totalorder %v477_v11, 256  ;;  %vm490_vm2 = vcmp.lt.s32.totalorder %v478_v12, 256  ;;  %vm491_vm3 = vcmp.lt.s32.totalorder %v479_v13, 256  ;;  %vm492_vm4 = vcmp.lt.s32.totalorder %v480_v14, 256 }
  0xd5   : > { %vm493_vm5 = vcmp.lt.s32.totalorder %v481_v15, 256  ;;  %vm494_vm6 = vcmp.lt.s32.totalorder %v482_v16, 256  ;;  %vm495_vm7 = vcmp.lt.s32.totalorder %v483_v17, 256  ;;  %vm496_vm8 = vcmp.lt.s32.totalorder %v484_v21, 256 }
  0xd6   : > { %vm497_vm9 = vcmp.lt.s32.totalorder %v485_v22, 256  ;;  %vm498_vm10 = vcmp.lt.s32.totalorder %v486_v23, 256  ;;  %vm499_vm11 = vcmp.lt.s32.totalorder %v487_v27, 256  ;;  %v500_v28 = vsel %vm488_vm0, %v1491_v18, 0.0 }
  0xd7   : > { %v501_v29 = vsel %vm489_vm1, %v1493_v19, 0.0  ;;  %v502_v36 = vsel %vm490_vm2, %v1495_v20, 0.0  ;;  %v503_v37 = vsel %vm491_vm3, %v1497_v24, 0.0  ;;  %v504_v38 = vsel %vm492_vm4, %v1499_v25, 0.0  ;;  %516 = vst [vmem:[#allocation2] sm:$0xff] (!%p841_p8), %v500_v28 }
  0xd8   : > { %v505_v39 = vsel %vm493_vm5, %v1501_v26, 0.0  ;;  %v506_v40 = vsel %vm494_vm6, %v1503_v30, 0.0  ;;  %v507_v41 = vsel %vm495_vm7, %v1505_v31, 0.0  ;;  %v508_v42 = vsel %vm496_vm8, %v1507_v32, 0.0  ;;  %517 = vst [vmem:[#allocation2 + $0x8] sm:$0xff] (!%p841_p8), %v501_v29  ;;  %518 = vst [vmem:[#allocation2 + $0x10] sm:$0xff] (!%p841_p8), %v502_v36 }
  0xd9   : > { %v509_v43 = vsel %vm497_vm9, %v1509_v33, 0.0  ;;  %v510_v18 = vsel %vm498_vm10, %v1511_v34, 0.0  ;;  %v511_v19 = vsel %vm499_vm11, %v1513_v35, 0.0  ;;  %519 = vst [vmem:[#allocation2 + $0x18] sm:$0xff] (!%p841_p8), %v503_v37  ;;  %520 = vst [vmem:[#allocation2 + $0x20] sm:$0xff] (!%p841_p8), %v504_v38 }
  0xda   : > { %521 = vst [vmem:[#allocation2 + $0x28] sm:$0xff] %v505_v39  ;;  %522 = vst [vmem:[#allocation2 + $0x30] sm:$0xff] %v506_v40 }
  0xdb   : > { %523 = vst [vmem:[#allocation2 + $0x38] sm:$0xff] %v507_v41  ;;  %524 = vst [vmem:[#allocation2 + $0x40] sm:$0xff] %v508_v42 }
  0xdc   : > { %525 = vst [vmem:[#allocation2 + $0x48] sm:$0xff] %v509_v43  ;;  %526 = vst [vmem:[#allocation2 + $0x50] sm:$0xff] %v510_v18 }
  0xdd   : > { %527 = vst [vmem:[#allocation2 + $0x58] sm:$0xff] %v511_v19 }
  0xde PF: > { %p842_p3 = scmp.le.s32.totalorder %s1178_s24, 0 }
  0xe0   : > { %531 = sbr.rel (%p842_p3) target bundleno = 236 (0xec), region = 76 }
  0xe2   : > { %v532_v20 = vld [vmem:[#allocation2] sm:$0xff] (!%p842_p3)  ;;  %v539_v47 = vld [vmem:[#allocation2 + $0x38] sm:$0xff] (!%p842_p3) }
  0xe3   : > { %v533_v24 = vld [vmem:[#allocation2 + $0x8] sm:$0xff] (!%p842_p3)  ;;  %v534_v25 = vld [vmem:[#allocation2 + $0x10] sm:$0xff] (!%p842_p3)  ;;  %v544_v26 = vadd.f32 (!%p842_p3), %v532_v20, %v500_v28  ;;  %v540_v48 = vld [vmem:[#allocation2 + $0x40] sm:$0xff] (!%p842_p3)  ;;  %v551_v50 = vadd.f32 (!%p842_p3), %v539_v47, %v507_v41 }
  0xe4   : > { %v545_v30 = vadd.f32 (!%p842_p3), %v533_v24, %v501_v29  ;;  %v546_v31 = vadd.f32 (!%p842_p3), %v534_v25, %v502_v36  ;;  %v535_v32 = vld [vmem:[#allocation2 + $0x18] sm:$0xff] (!%p842_p3)  ;;  %v536_v33 = vld [vmem:[#allocation2 + $0x20] sm:$0xff] (!%p842_p3)  ;;  %v552_v51 = vadd.f32 (!%p842_p3), %v540_v48, %v508_v42  ;;  %v541_v52 = vld [vmem:[#allocation2 + $0x48] sm:$0xff] (!%p842_p3) }
  0xe5   : > { %v537_v34 = vld [vmem:[#allocation2 + $0x28] sm:$0xff] (!%p842_p3)  ;;  %v547_v35 = vadd.f32 (!%p842_p3), %v535_v32, %v503_v37  ;;  %v548_v44 = vadd.f32 (!%p842_p3), %v536_v33, %v504_v38  ;;  %v538_v46 = vld [vmem:[#allocation2 + $0x30] sm:$0xff] (!%p842_p3)  ;;  %556 = vst [vmem:[#allocation2] sm:$0xff] (!%p842_p3), %v544_v26  ;;  %v543_v54 = vld [vmem:[#allocation2 + $0x58] sm:$0xff] (!%p842_p3)  ;;  %v553_v55 = vadd.f32 (!%p842_p3), %v541_v52, %v509_v43 }
  0xe6   : > { %v549_v45 = vadd.f32 (!%p842_p3), %v537_v34, %v505_v39  ;;  %557 = vst [vmem:[#allocation2 + $0x8] sm:$0xff] (!%p842_p3), %v545_v30  ;;  %558 = vst [vmem:[#allocation2 + $0x10] sm:$0xff] (!%p842_p3), %v546_v31  ;;  %v550_v49 = vadd.f32 (!%p842_p3), %v538_v46, %v506_v40  ;;  %v542_v53 = vld [vmem:[#allocation2 + $0x50] sm:$0xff] (!%p842_p3)  ;;  %v555_v57 = vadd.f32 (!%p842_p3), %v543_v54, %v511_v19 }
  0xe7   : > { %559 = vst [vmem:[#allocation2 + $0x18] sm:$0xff] %v547_v35  ;;  %560 = vst [vmem:[#allocation2 + $0x20] sm:$0xff] %v548_v44  ;;  %v554_v56 = vadd.f32 %v542_v53, %v510_v18 }
  0xe8   : > { %561 = vst [vmem:[#allocation2 + $0x28] sm:$0xff] %v549_v45  ;;  %562 = vst [vmem:[#allocation2 + $0x30] sm:$0xff] %v550_v49 }
  0xe9   : > { %563 = vst [vmem:[#allocation2 + $0x38] sm:$0xff] %v551_v50  ;;  %564 = vst [vmem:[#allocation2 + $0x40] sm:$0xff] %v552_v51 }
  0xea   : > { %565 = vst [vmem:[#allocation2 + $0x48] sm:$0xff] %v553_v55  ;;  %566 = vst [vmem:[#allocation2 + $0x50] sm:$0xff] %v554_v56 }
  0xeb   : > { %567 = vst [vmem:[#allocation2 + $0x58] sm:$0xff] %v555_v57 }
  0xec PF: > { %p843_p11 = scmp.ne.s32.totalorder %s1178_s24, 1 }
  0xed   : > { %p844_p13 = scmp.ne.s32.totalorder (!%p843_p11), %s1182_s25, 0 }
  0xee   : > { %571 = sbr.rel (%p843_p11) target bundleno = 810 (0x32a), region = 80 }
  0xef   : > { %v577_v2 = vld [vmem:[#allocation2 + $0x28] sm:$0xff] (!%p843_p11)  ;;  %v578_v4 = vld [vmem:[#allocation2 + $0x30] sm:$0xff] (!%p843_p11) }
  0xf0   : > { %v579_v6 = vld [vmem:[#allocation2 + $0x38] sm:$0xff] (!%p843_p11)  ;;  %v580_v8 = vld [vmem:[#allocation2 + $0x40] sm:$0xff] (!%p843_p11) }
  0xf1   : > { %v572_v58 = vld [vmem:[#allocation2] sm:$0xff] (!%p843_p11)  ;;  %v581_v10 = vld [vmem:[#allocation2 + $0x48] sm:$0xff] (!%p843_p11)  ;;  %v582_v12 = vld [vmem:[#allocation2 + $0x50] sm:$0xff] (!%p843_p11) }
  0xf2   : > { %v573_v59 = vld [vmem:[#allocation2 + $0x8] sm:$0xff] (!%p843_p11)  ;;  %v574_v60 = vld [vmem:[#allocation2 + $0x10] sm:$0xff] (!%p843_p11)  ;;  %v583_v14 = vld [vmem:[#allocation2 + $0x58] sm:$0xff] (!%p843_p11) }
  0xf3   : > { %v584_v61 = vadd.f32 (!%p843_p11), %v573_v59, %v572_v58  ;;  %v575_v62 = vld [vmem:[#allocation2 + $0x18] sm:$0xff] (!%p843_p11)  ;;  %v576_v0 = vld [vmem:[#allocation2 + $0x20] sm:$0xff] (!%p843_p11) }
  0xf5   : > { %v585_v63 = vadd.f32 %v584_v61, %v574_v60  ;;  %v610_v36 = vld [vmem:[%s1648_s0] sm:$0xff] (!%p844_p13)  ;;  %vm611_vm12 = vcmask (!%p844_p13), 261120   ;;  %v1203_v40 = vmov (!%p844_p13), 0   ;;  %v623_v25 = vlaneseq (!%p844_p13) }
  0xf6   : > { %v645_v37 = vld [vmem:[#allocation3] sm:$0xff] (!%p844_p13)  ;;  %v612_v39 = vsel (!%p844_p13), %vm611_vm12, %v610_v36, -inf  ;;  %974 = vset.pattern.permute.xlu1 (!%p844_p13), %v1203_v40  ;;  %975 = vset.pattern.permute.xlu0 (!%p844_p13), %v1203_v40  ;;  %vm634_vm14 = vcmask (!%p844_p13), 7168  }
  0xf7   : > { %v586_v1 = vadd.f32 %v585_v63, %v575_v62  ;;  %v609_v38 = vld [vmem:[%s1650_s2] sm:$0xff] (!%p844_p13)  ;;  %v646_v41 = vsel (!%p844_p13), %vm611_vm12, %v645_v37, -inf  ;;  %v624_v26 = vand.u32 (!%p844_p13), 127, %v623_v25 }
  0xf8   : > { %626 = vperm.xlu1 (!%p844_p13), %974, %v609_v38  }
  0xf9   : > { %v587_v3 = vadd.f32 %v586_v1, %v576_v0 }
  0xfb   : > { %v588_v5 = vadd.f32 %v587_v3, %v577_v2 }
  0xfd   : > { %v589_v7 = vadd.f32 %v588_v5, %v578_v4 }
  0xff   : > { %v590_v9 = vadd.f32 %v589_v7, %v579_v6 }
 0x101   : > { %v591_v11 = vadd.f32 %v590_v9, %v580_v8 }
 0x103   : > { %v592_v13 = vadd.f32 %v591_v11, %v581_v10 }
 0x105   : > { %v593_v15 = vadd.f32 %v592_v13, %v582_v12 }
 0x107   : > { %v594_v16 = vadd.f32 %v593_v15, %v583_v14 }
 0x109   : > { %595 = vadd.xlane.f32.xlu0 %v594_v16 }
 0x10d   : > { %613 = vmax.xlane.f32.xlu0 (!%p844_p13), %v612_v39 }
 0x111   : > { %647 = vmax.xlane.f32.xlu0 (!%p844_p13), %v646_v41 }
 0x177   : > { %v627_v31 = vpop.permute.xlu1 (!%p844_p13), %626 }
 0x178   : > { %vm628_vm13 = vcmp.eq.s32.totalorder (!%p844_p13), %v624_v26, %v627_v31 }
 0x196   : > { %v596_v17 = vpop.xlane.xlu0 %595 }
 0x197   : > { %v597_v21 = vrot.slane %v596_v17, 4 }
 0x199   : > { %v598_v22 = vadd.f32 %v597_v21, %v596_v17 }
 0x19a   : > { %v614_v42 = vpop.xlane.xlu0 (!%p844_p13), %613 }
 0x19b   : > { %v599_v23 = vrot.slane %v598_v22, 2  ;;  %v615_v43 = vsub.f32 (!%p844_p13), %v610_v36, %v614_v42 }
 0x19d   : > { %v600_v27 = vadd.f32 %v599_v23, %v598_v22  ;;  %v616_v18 = vmul.f32 (!%p844_p13), 1.442695, %v615_v43  ;;  %v629_v35 = vsel (!%p844_p13), %vm628_vm13, %v615_v43, 0.0 }
 0x19e   : > { %v648_v19 = vpop.xlane.xlu0 (!%p844_p13), %647  ;;  %v630_v44 = vsel (!%p844_p13), %vm611_vm12, %v629_v35, 0.0 }
 0x19f   : > { %v601_v28 = vrot.slane %v600_v27, 1  ;;  %976 = vpow2.f32 (!%p844_p13), %v616_v18  ;;  %v649_v20 = vsub.f32 (!%p844_p13), %v645_v37, %v648_v19 }
 0x1a1   : > { %v602_v29 = vadd.f32 %v601_v28, %v600_v27  ;;  %v650_v24 = vmul.f32 (!%p844_p13), 1.442695, %v649_v20  ;;  %v657_v45 = vsel (!%p844_p13), %vm628_vm13, %v649_v20, 0.0 }
 0x1a2   : > { %v658_v46 = vsel (!%p844_p13), %vm611_vm12, %v657_v45, 0.0 }
 0x1a3   : > { %855 = vpush %v602_v29  ;;  %978 = vpow2.f32 (!%p844_p13), %v650_v24 }
 0x1a9   : > { %v977_v30 = vpop.eup (!%p844_p13), %976 }
 0x1aa   : > { %v618_v32 = vsel (!%p844_p13), %vm611_vm12, %v977_v30, 0.0 }
 0x1ab   : > { %619 = vadd.xlane.f32.xlu1 (!%p844_p13), %v618_v32 }
 0x1ad   : > { %v979_v33 = vpop.eup (!%p844_p13), %978 }
 0x1ae   : > { %v652_v34 = vsel (!%p844_p13), %vm611_vm12, %v979_v33, 0.0 }
 0x1af   : > { %653 = vadd.xlane.f32.xlu0 (!%p844_p13), %v652_v34 }
 0x1b3   : > { %631 = vadd.xlane.f32.xlu0 (!%p844_p13), %v630_v44 }
 0x1b7   : > { %659 = vadd.xlane.f32.xlu0 (!%p844_p13), %v658_v46 }
 0x1cf   : > { %608 = sbr.rel (%p844_p13) target bundleno = 801 (0x321), region = 84 }
 0x1d4   : > { %s1562_s24 = spop %855 }
 0x1d5   : > { %s604_s1 = smul.f32 -1e-07, %s1562_s24 }
 0x238   : > { %v620_v47 = vpop.xlane.xlu1 %619 }
 0x239   : > { %980 = vlog2.f32 %v620_v47 }
 0x23c   : > { %v654_v48 = vpop.xlane.xlu0 %653 }
 0x23d   : > { %982 = vlog2.f32 %v654_v48 }
 0x240   : > { %v632_v50 = vpop.xlane.xlu0 %631 }
 0x243   : > { %v981_v49 = vpop.eup %980 }
 0x244   : > { %v622_v51 = vmul.f32 0.6931472, %v981_v49  ;;  %v660_v56 = vpop.xlane.xlu0 %659 }
 0x246   : > { %v633_v52 = vsub.f32 %v622_v51, %v632_v50 }
 0x247   : > { %v983_v53 = vpop.eup %982 }
 0x248   : > { %v656_v54 = vmul.f32 0.6931472, %v983_v53  ;;  %v635_v55 = vsel %vm634_vm14, %v633_v52, 0.0 }
 0x249   : > { %636 = vadd.xlane.f32.xlu0 %v635_v55 }
 0x24a   : > { %v661_v57 = vsub.f32 %v656_v54, %v660_v56 }
 0x24c   : > { %v662_v58 = vsel %vm634_vm14, %v661_v57, 0.0 }
 0x24d   : > { %663 = vadd.xlane.f32.xlu0 %v662_v58 }
 0x2d6   : > { %v637_v59 = vpop.xlane.xlu0 %636 }
 0x2d7   : > { %v638_v60 = vrot.slane %v637_v59, 4 }
 0x2d9   : > { %v639_v61 = vadd.f32 %v638_v60, %v637_v59 }
 0x2da   : > { %v664_v62 = vpop.xlane.xlu0 %663 }
 0x2db   : > { %v640_v63 = vrot.slane %v639_v61, 2  ;;  %v665_v0 = vrot.slane %v664_v62, 4 }
 0x2dd   : > { %v666_v1 = vadd.f32 %v665_v0, %v664_v62  ;;  %v641_v2 = vadd.f32 %v640_v63, %v639_v61 }
 0x2df   : > { %v667_v3 = vrot.slane %v666_v1, 2  ;;  %v642_v4 = vrot.slane %v641_v2, 1 }
 0x2e1   : > { %v668_v5 = vadd.f32 %v667_v3, %v666_v1  ;;  %v643_v6 = vadd.f32 %v642_v4, %v641_v2 }
 0x2e3   : > { %857 = vpush %v643_v6  ;;  %v669_v7 = vrot.slane %v668_v5, 1 }
 0x2e5   : > { %v670_v8 = vadd.f32 %v669_v7, %v668_v5 }
 0x2e7   : > { %859 = vpush %v670_v8 }
 0x314   : > { %s858_s16 = spop %857 }
 0x318   : > { %s860_s7 = spop %859 }
 0x319   : > { %s672_s17 = sadd.f32 %s860_s7, %s858_s16 }
 0x31b   : > { %s675_s10 = smul.f32 0.125, %s672_s17 }
 0x31d   : > { %s676_s21 = sadd.f32 %s675_s10, %s604_s1 }
 0x31f   : > { %v677_v9 = vstv %s676_s21 }
 0x320   : > { %678 = vst [vmem:[%s1516_s15] sm:$0xff] %v677_v9 }
 0x321 PF: > { %p845_p1 = scmp.eq.s32.totalorder %s1182_s25, 0 }
 0x322   : > { %v683_v10 = vstv (!%p845_p1), %s604_s1 }
 0x323   : > { %682 = sbr.rel (%p845_p1) target bundleno = 810 (0x32a), region = 88  ;;  %684 = vst [vmem:[%s1516_s15] sm:$0xff] (!%p845_p1), %v683_v10 }
 0x32a PF: > { %s847_s9 = sshll.u32 %s1182_s25, 7  ;;  %s699_s30 = sshll.u32 %s1516_s15, 4  ;;  %s700_s30 = int_to_ptr.vmem [resolvable:$true] %s699_s30 }
 0x32b   : > { %s1589_s8 = scalar_lea.hbm %s1653_s5, %s847_s9  ;;  %s686_s29 = scalar_lea.sflag [#allocation5], %s338_s3 }
 0x32c   : > { %s1068_s6 = scalar_lea.vmem %s700_s30, 128  ;;  %p1688_p4 = scmp.ne.s32.totalorder %s1675_s12, 0 }
 0x32d   : > { %p1069_p6 = scmp.ne.s32.totalorder %s700_s30, %s1068_s6  ;;  %s1204_s24 = smov [#allocation9]  }
 0x32e   : > { %s1072_s1 = sshll.u32 %s1204_s24, 4  ;;  %s1073_s1 = int_to_ptr.vmem [resolvable:$false] %s1072_s1 }
 0x32f   : > { %p1070_p10 = pnand %p1069_p6, %p1688_p4  ;;  %s1074_s27 = scalar_lea.vmem %s1073_s1, 256 }
 0x330   : > { %p1075_p7 = scmp.lt.s32.totalorder %s700_s30, %s1073_s1  ;;  %p1076_p0 = scmp.lt.s32.totalorder %s1074_s27, %s1068_s6 }
 0x331   : > { %p1071_p12 = pneg %p1070_p10 }
 0x332   : > { %p1077_p5 = por %p1076_p0, %p1075_p7 }
 0x334   : > { %p1078_p9 = pnand %p1077_p5, %p1071_p12 }
 0x336   : > { %1081 = shalt.err (!%p1078_p9)
}
 0x337   : > { %s1082_s25 = scalar_lea.hbm %s1589_s8, 128  ;;  %s1086_s14 = scalar_lea.hbm %s1653_s5, 256 }
 0x338   : > { %p1083_p2 = scmp.ne.s32.totalorder %s1589_s8, %s1082_s25  ;;  %p1087_p11 = scmp.lt.u32.totalorder %s1589_s8, %s1653_s5 }
 0x339   : > { %p1088_p13 = scmp.lt.u32.totalorder %s1086_s14, %s1082_s25  ;;  %p1090_p6 = scmp.lt.u32.totalorder %s1082_s25, %s1589_s8 }
 0x33a   : > { %p1084_p8 = pnand %p1083_p2, %p1688_p4 }
 0x33b   : > { %p1089_p1 = por %p1088_p13, %p1087_p11 }
 0x33c   : > { %p1085_p3 = pneg %p1084_p8 }
 0x33d   : > { %p1091_p10 = por %p1090_p6, %p1089_p1 }
 0x33f   : > { %p1092_p12 = pnand %p1091_p10, %p1085_p3 }
 0x341   : > { %1095 = shalt.err (!%p1092_p12)
}
 0x342   : > { %867 = dma.vmem_to_hbm [thread:$0]  (%p1688_p4), %s700_s30, 128, %s1589_s8, %s686_s29  }
 0x343 PF: > { %s1689_s16 = sld [smem:[#allocation20_spill]]  ;;  %p879_p7 = scmp.ge.s32.totalorder %s1194_s28, 2 }
 0x344   : > { %s711_s7 = sand.u32 1, %s1154_s18  }
 0x345   : > { %s712_s17 = scalar_lea.sflag [#allocation5], %s711_s7 }
 0x349   : > { %p1690_p0 = scmp.ne.s32.totalorder %s1689_s16, 0 }
 0x34b   : > { %p874_p5 = pnand %p879_p7, %p1690_p0 }
 0x34d   : > { %1149 = dma.done.wait (!%p874_p5), %s712_s17, 128  }
 0x34e   : > { %1151 = vsyncadd (!%p874_p5), %s712_s17, 4294967168  ;;  %s22_s28 = sadd.s32 1, %s1194_s28   ;;  %s1691_s10 = sld [smem:[#allocation13_spill]] }
 0x34f   : > { %p19_p9 = scmp.ge.s32.totalorder %s22_s28, 6   ;;  %s1692_s20 = sld [smem:[#allocation18_spill]] }
 0x350   : > { %s1693_s12 = sld [smem:[#allocation19_spill]]  ;;  %s1694_s24 = sld [smem:[#allocation14_spill]] }
 0x351   : > { %s1695_s25 = sld [smem:[#allocation15_spill]]  ;;  %s1696_s26 = sld [smem:[#allocation16_spill]] }
 0x352   : > { %s1697_s27 = sld [smem:[#allocation17_spill]]  ;;  %s1698_s18 = smov %s1158_s19 }
 0x353   : > { %s1700_s21 = smov %s1170_s22  ;;  %s1701_s22 = smov %s1174_s23 }
 0x354   : > { %s1699_s19 = smov %s1691_s10  ;;  %21 = sbr.rel (!%p19_p9) target bundleno = 13 (0xd), region = 137 }
 0x356   : > { %s1702_s23 = smov %s1693_s12 }
 0x35b   :  { %717 = vsyncpa [#allocation4], 1 }
 0x35c   :  { %719 = vsyncpa [#allocation4 + $0x1], 1 }
 0x35d   :  { %720 = vsyncpa [#allocation7], 1 }
 0x35e   :  { %722 = vsyncpa [#allocation7 + $0x1], 1 }
 0x35f   :  { %723 = vsyncpa [#allocation5], 1 }
 0x360   :  { %725 = vsyncpa [#allocation5 + $0x1], 1 }

</bundles_post_ra>
